<compile_context>
chip_gen: v7x
topology: tpu7x:2x2x1
jax: 0.10.0
libtpu: 0.0.40
codegen_flags: <defaults>
</compile_context>

<pallas_src>
import functools

import jax
import jax.numpy as jnp
from jax.experimental import pallas as pl
from jax.experimental.pallas import tpu as pltpu

_EPS = 1e-5
_LANE = 128   # lane width: Cout / K padded to multiples of this
_TM_MAX = 256  # max rows of the im2col matrix processed per grid step


# --------------------------- Pallas kernels ---------------------------------

def _conv_bn_kernel(p_ref, w_ref, b_ref, o_ref, acc_ref, *, relu):
    """(TM, TK) @ (TK, Cp) accumulated over the K grid axis, then +bias (+ReLU)."""
    k = pl.program_id(1)

    @pl.when(k == 0)
    def _():
        acc_ref[...] = jnp.zeros_like(acc_ref)

    acc_ref[...] += jnp.dot(p_ref[...], w_ref[...],
                            preferred_element_type=jnp.float32)

    @pl.when(k == pl.num_programs(1) - 1)
    def _():
        y = acc_ref[...] + b_ref[...]
        if relu:
            y = jnp.maximum(y, 0.0)
        o_ref[...] = y.astype(o_ref.dtype)


def _conv_bn_add_relu_kernel(p_ref, w_ref, b_ref, sc_ref, o_ref, acc_ref):
    """Same as above but with the residual shortcut fused: relu(acc + b + sc)."""
    k = pl.program_id(1)

    @pl.when(k == 0)
    def _():
        acc_ref[...] = jnp.zeros_like(acc_ref)

    acc_ref[...] += jnp.dot(p_ref[...], w_ref[...],
                            preferred_element_type=jnp.float32)

    @pl.when(k == pl.num_programs(1) - 1)
    def _():
        y = acc_ref[...] + b_ref[...] + sc_ref[...]
        o_ref[...] = jnp.maximum(y, 0.0).astype(o_ref.dtype)


# --------------------------- kernel wrapper ----------------------------------

def _round_up(x, n):
    return ((x + n - 1) // n) * n


def _pick_tm(m):
    m8 = _round_up(m, 8)
    if m8 <= 16:
        return m8
    # aim for >=2 row blocks (v7x has 2 TensorCores), cap block rows at _TM_MAX
    return min(_TM_MAX, _round_up(m8 // 2, 8))


def _pad2d(x, rows, cols):
    r, c = x.shape
    if r == rows and c == cols:
        return x
    return jnp.pad(x, ((0, rows - r), (0, cols - c)))


def conv_bn_matmul(patches, w2d, scale, bias, *, relu, shortcut=None):
    """Fused conv-as-matmul + folded BatchNorm (+ residual add + ReLU).

    patches: (M, K) f32, w2d: (K, Cout), scale/bias: (1, Cout),
    shortcut: optional (M, Cout) added before the final ReLU.
    """
    m, k = patches.shape
    cout = w2d.shape[1]

    # Fold BN scale into the weights -> epilogue is only +bias (+sc, +ReLU).
    w2d = w2d * scale

    tm = _pick_tm(m)
    tk = _LANE
    m_pad = _round_up(m, tm)
    k_pad = _round_up(k, tk)
    c_pad = _round_up(cout, _LANE)

    patches = _pad2d(patches, m_pad, k_pad)
    w2d = _pad2d(w2d, k_pad, c_pad)
    bias = _pad2d(bias, 1, c_pad)

    in_specs = [
        pl.BlockSpec((tm, tk), lambda i, kk: (i, kk)),
        pl.BlockSpec((tk, c_pad), lambda i, kk: (kk, 0)),
        pl.BlockSpec((1, c_pad), lambda i, kk: (0, 0)),
    ]
    args = [patches, w2d, bias]

    if shortcut is not None:
        args.append(_pad2d(shortcut, m_pad, c_pad))
        in_specs.append(pl.BlockSpec((tm, c_pad), lambda i, kk: (i, 0)))
        kernel = _conv_bn_add_relu_kernel
    else:
        kernel = functools.partial(_conv_bn_kernel, relu=relu)

    out = pl.pallas_call(
        kernel,
        out_shape=jax.ShapeDtypeStruct((m_pad, c_pad), jnp.float32),
        grid=(m_pad // tm, k_pad // tk),
        in_specs=in_specs,
        out_specs=pl.BlockSpec((tm, c_pad), lambda i, kk: (i, 0)),
        scratch_shapes=[pltpu.VMEM((tm, c_pad), jnp.float32)],
        compiler_params=pltpu.CompilerParams(
            dimension_semantics=("parallel", "arbitrary"),
            vmem_limit_bytes=32 * 1024 * 1024,
        ),
    )(*args)
    return out[:m, :cout]


# --------------------------- plain-JAX glue ----------------------------------

def _im2col(x_nhwc, kh, kw, stride, padding):
    n, h, w, c = x_nhwc.shape
    ho = (h + 2 * padding - kh) // stride + 1
    wo = (w + 2 * padding - kw) // stride + 1
    xp = jnp.pad(x_nhwc, ((0, 0), (padding, padding), (padding, padding), (0, 0)))
    cols = []
    for i in range(kh):
        for j in range(kw):
            cols.append(xp[:, i:i + stride * ho:stride, j:j + stride * wo:stride, :])
    patches = jnp.stack(cols, axis=3)  # (N, Ho, Wo, kh*kw, C)
    return patches.reshape(n * ho * wo, kh * kw * c), (n, ho, wo)


def _w2d(w_oihw):
    cout = w_oihw.shape[0]
    return jnp.transpose(w_oihw, (2, 3, 1, 0)).reshape(-1, cout)


def _fold_bn(bn):
    scale = bn["gamma"] / jnp.sqrt(bn["var"] + _EPS)
    bias = bn["beta"] - bn["mean"] * scale
    return scale.reshape(1, -1), bias.reshape(1, -1)


def residual_block_forward(x_nchw, params, *, stride):
    x = jnp.transpose(x_nchw, (0, 2, 3, 1)).astype(jnp.float32)  # NHWC
    in_ch = x.shape[-1]
    out_ch = params["w1"].shape[0]

    # shortcut first, so it can be fused into the second conv's epilogue
    if stride != 1 or in_ch != out_ch:
        kh = params["ws"].shape[2]
        ps, _ = _im2col(x, kh, kh, stride, 0)
        ss, bs = _fold_bn(params["bns"])
        ysc = conv_bn_matmul(ps, _w2d(params["ws"]), ss, bs, relu=False)
    else:
        ysc = x.reshape(-1, in_ch)  # identity shortcut (same row ordering)

    # left: conv3x3(stride) -> BN -> ReLU
    p1, (n, ho, wo) = _im2col(x, 3, 3, stride, 1)
    s1, b1 = _fold_bn(params["bn1"])
    y1 = conv_bn_matmul(p1, _w2d(params["w1"]), s1, b1, relu=True)
    y1 = y1.reshape(n, ho, wo, out_ch)

    # left: conv3x3(stride=1) -> BN, fused with (+ shortcut, ReLU)
    p2, _ = _im2col(y1, 3, 3, 1, 1)
    s2, b2 = _fold_bn(params["bn2"])
    out = conv_bn_matmul(p2, _w2d(params["w2"]), s2, b2, relu=True, shortcut=ysc)

    out = out.reshape(n, ho, wo, out_ch)
    return jnp.transpose(out, (0, 3, 1, 2))  # back to NCHW


# --------------------------- reference (pure JAX) -----------------------------

def _ref_forward(x_nchw, params, *, stride):
    def conv(x, w, s, pad):
        return jax.lax.conv_general_dilated(
            x, w, window_strides=(s, s), padding=((pad, pad), (pad, pad)),
            dimension_numbers=("NCHW", "OIHW", "NCHW"))

    def bn(x, p):
        sc = p["gamma"] / jnp.sqrt(p["var"] + _EPS)
        b = p["beta"] - p["mean"] * sc
        return x * sc[None, :, None, None] + b[None, :, None, None]

    y = jax.nn.relu(bn(conv(x_nchw, params["w1"], stride, 1), params["bn1"]))
    y = bn(conv(y, params["w2"], 1, 1), params["bn2"])
    sc = bn(conv(x_nchw, params["ws"], stride, 0), params["bns"])
    return jax.nn.relu(y + sc)


# --------------------------- param init --------------------------------------

def _init_bn(key, c):
    k1, k2, k3, k4 = jax.random.split(key, 4)
    return {
        "gamma": jax.random.uniform(k1, (c,), jnp.float32, 0.5, 1.5),
        "beta": 0.1 * jax.random.normal(k2, (c,), jnp.float32),
        "mean": 0.1 * jax.random.normal(k3, (c,), jnp.float32),
        "var": jax.random.uniform(k4, (c,), jnp.float32, 0.5, 1.5),
    }


def init_params(key, in_ch, out_ch, ksize, sc_ksize):
    keys = jax.random.split(key, 6)
    return {
        "w1": 0.1 * jax.random.normal(keys[0], (out_ch, in_ch, ksize, ksize), jnp.float32),
        "bn1": _init_bn(keys[1], out_ch),
        "w2": 0.1 * jax.random.normal(keys[2], (out_ch, out_ch, ksize, ksize), jnp.float32),
        "bn2": _init_bn(keys[3], out_ch),
        "ws": 0.1 * jax.random.normal(keys[4], (out_ch, in_ch, sc_ksize, sc_ksize), jnp.float32),
        "bns": _init_bn(keys[5], out_ch),
    }


# --------------------------- main ---------------------------------------------

if __name__ == "__main__":
    key = jax.random.PRNGKey(0)
    kx, kp = jax.random.split(key)

    in_ch, out_ch, ksize, sc_ksize, stride = 4, 8, 3, 1, 2
    x = jax.random.normal(kx, (2, in_ch, 16, 16), jnp.float32)  # NCHW, like PyTorch
    params = init_params(kp, in_ch, out_ch, ksize, sc_ksize)

    out = residual_block_forward(x, params, stride=stride)
    out = jax.block_until_ready(out)

    ref = jax.block_until_ready(_ref_forward(x, params, stride=stride))
    assert out.shape == ref.shape == (2, out_ch, 8, 8), out.shape
    assert jnp.allclose(out, ref, atol=1e-4, rtol=1e-4), float(jnp.max(jnp.abs(out - ref)))

    print("KERNEL_OK")
</pallas_src>

<mosaic_0001>
module attributes {stable_mosaic.version = 11 : i64} {
  func.func @_conv_bn_kernel(%arg0: i32, %arg1: i32, %arg2: memref<64x128xf32, #tpu.memory_space<vmem>>, %arg3: memref<128x128xf32, #tpu.memory_space<vmem>>, %arg4: memref<1x128xf32, #tpu.memory_space<vmem>>, %arg5: memref<64x128xf32, #tpu.memory_space<vmem>>, %arg6: memref<64x128xf32, #tpu.memory_space<vmem>>) attributes {dimension_semantics = [#tpu.dimension_semantics<parallel>, #tpu.dimension_semantics<arbitrary>], iteration_bounds = array<i64: 2, 1>, scalar_prefetch = 0 : i64, scratch_operands = 1 : i64, tpu.core_type = #tpu.core_type<tc>, window_params = [{transform_indices = @transform_0, window_bounds = array<i64: 64, 128>}, {transform_indices = @transform_1, window_bounds = array<i64: 128, 128>}, {pipeline_mode = #tpu.pipeline_mode<synchronous>, transform_indices = @transform_2, window_bounds = array<i64: 1, 128>}, {transform_indices = @transform_3, window_bounds = array<i64: 64, 128>}]} {
    %c0_i32 = arith.constant 0 : i32
    %0 = arith.cmpi eq, %arg1, %c0_i32 : i32
    %1 = arith.extui %0 : i1 to i32
    %c0_i32_0 = arith.constant 0 : i32
    %2 = arith.cmpi ne, %1, %c0_i32_0 : i32
    scf.if %2 {
      %cst_10 = arith.constant 0.000000e+00 : f32
      %12 = vector.broadcast %cst_10 : f32 to vector<64x128xf32>
      %c0_11 = arith.constant 0 : index
      %c0_12 = arith.constant 0 : index
      %13 = vector.load %arg6[%c0_11, %c0_12] : memref<64x128xf32, #tpu.memory_space<vmem>>, vector<64x128xf32>
      tpu.vector_store %arg6[%c0_11, %c0_12], %12 {strides = array<i32>} : memref<64x128xf32, #tpu.memory_space<vmem>>, vector<64x128xf32>,
    } else {
    }
    %c0 = arith.constant 0 : index
    %c0_1 = arith.constant 0 : index
    %3 = vector.load %arg6[%c0, %c0_1] : memref<64x128xf32, #tpu.memory_space<vmem>>, vector<64x128xf32>
    %c0_2 = arith.constant 0 : index
    %c0_3 = arith.constant 0 : index
    %4 = vector.load %arg2[%c0_2, %c0_3] : memref<64x128xf32, #tpu.memory_space<vmem>>, vector<64x128xf32>
    %c0_4 = arith.constant 0 : index
    %c0_5 = arith.constant 0 : index
    %5 = vector.load %arg3[%c0_4, %c0_5] : memref<128x128xf32, #tpu.memory_space<vmem>>, vector<128x128xf32>
    %cst = arith.constant dense<0.000000e+00> : vector<64x128xf32>
    %6 = tpu.matmul %4, %5, %cst {dimension_numbers = #tpu.dot_dimension_numbers<[1], [0], [0], [1], [0, 0, 1, 1], [], []>} : vector<64x128xf32>, vector<128x128xf32>, vector<64x128xf32> -> vector<64x128xf32>
    %7 = arith.addf %3, %6 : vector<64x128xf32>
    %c0_6 = arith.constant 0 : index
    %c0_7 = arith.constant 0 : index
    %8 = vector.load %arg6[%c0_6, %c0_7] : memref<64x128xf32, #tpu.memory_space<vmem>>, vector<64x128xf32>
    tpu.vector_store %arg6[%c0_6, %c0_7], %7 {strides = array<i32>} : memref<64x128xf32, #tpu.memory_space<vmem>>, vector<64x128xf32>,
    %c0_i32_8 = arith.constant 0 : i32
    %9 = arith.cmpi eq, %arg1, %c0_i32_8 : i32
    %10 = arith.extui %9 : i1 to i32
    %c0_i32_9 = arith.constant 0 : i32
    %11 = arith.cmpi ne, %10, %c0_i32_9 : i32
    scf.if %11 {
      %c0_10 = arith.constant 0 : index
      %c0_11 = arith.constant 0 : index
      %12 = vector.load %arg6[%c0_10, %c0_11] : memref<64x128xf32, #tpu.memory_space<vmem>>, vector<64x128xf32>
      %c0_12 = arith.constant 0 : index
      %c0_13 = arith.constant 0 : index
      %13 = vector.load %arg4[%c0_12, %c0_13] : memref<1x128xf32, #tpu.memory_space<vmem>>, vector<1x128xf32>
      %14 = vector.broadcast %13 : vector<1x128xf32> to vector<64x128xf32>
      %15 = arith.addf %12, %14 : vector<64x128xf32>
      %c0_14 = arith.constant 0 : index
      %c0_15 = arith.constant 0 : index
      %16 = vector.load %arg5[%c0_14, %c0_15] : memref<64x128xf32, #tpu.memory_space<vmem>>, vector<64x128xf32>
      tpu.vector_store %arg5[%c0_14, %c0_15], %15 {strides = array<i32>} : memref<64x128xf32, #tpu.memory_space<vmem>>, vector<64x128xf32>,
    } else {
    }
    return
  }
  func.func @transform_0(%arg0: i32, %arg1: i32) -> (i32, i32) {
    %c0_i32 = arith.constant 0 : i32
    return %arg0, %arg1 : i32, i32
  }
  func.func @transform_1(%arg0: i32, %arg1: i32) -> (i32, i32) {
    %c0_i32 = arith.constant 0 : i32
    %c0_i32_0 = arith.constant 0 : i32
    return %arg1, %c0_i32 : i32, i32
  }
  func.func @transform_2(%arg0: i32, %arg1: i32) -> (i32, i32) {
    %c0_i32 = arith.constant 0 : i32
    %c0_i32_0 = arith.constant 0 : i32
    %c0_i32_1 = arith.constant 0 : i32
    return %c0_i32, %c0_i32_0 : i32, i32
  }
  func.func @transform_3(%arg0: i32, %arg1: i32) -> (i32, i32) {
    %c0_i32 = arith.constant 0 : i32
    %c0_i32_0 = arith.constant 0 : i32
    return %arg0, %c0_i32 : i32, i32
  }
}

</mosaic_0001>

<bundles_post_ra>
// kernel: tpu_custom_call.1
= control target key start
LH: loop header
LB: loop body
LE: loop exit
PB: predicated region body
PF: predicated region fallthrough
CT: control target
= control target key end

     0   :  { %8 = vsyncpa [#allocation4], 0  ;;  %s1166_s0 = inlined_call_operand.hbm [shape: f32[128,128], index: 0, kind: input, shape index: {}]   ;;  %s1167_s1 = inlined_call_operand.hbm [shape: f32[128,128], index: 1, kind: input, shape index: {}]   ;;  %s1168_s2 = inlined_call_operand.vmem [shape: f32[1,128], index: 2, kind: input, shape index: {}]   ;;  %s1169_s3 = inlined_call_operand.hbm [shape: f32[128,128], index: 3, kind: output, shape index: {}]  }
   0x1   :  { %10 = vsyncpa [#allocation4 + $0x1], 0 }
   0x2   :  { %11 = vsyncpa [#allocation7], 0 }
   0x3   :  { %12 = vsyncpa [#allocation5], 0 }
   0x4   :  { %14 = vsyncpa [#allocation5 + $0x1], 0  ;;  %s924_s12 = smov 0   ;;  %s926_s13 = smov 0  }
   0x5   :  { %s928_s14 = smov 0   ;;  %s930_s15 = smov 0  }
   0x6   :  { %s932_s16 = smov 0   ;;  %s934_s17 = smov 0  }
   0x7 LB: > { %s538_s18 = sadd.s32 4294967295, %s895_s17   ;;  %s539_s19 = sadd.s32 4294967294, %s895_s17   ;;  %s895_s17 = sphi %s934_s17, %s20_s17   ;;  %s891_s16 = sphi %s932_s16, %s1193_s16   ;;  %s887_s15 = sphi %s930_s15, %s1192_s15   ;;  %s883_s14 = sphi %s928_s14, %s1191_s14   ;;  %s879_s13 = sphi %s926_s13, %s1190_s13   ;;  %s875_s12 = sphi %s924_s12, %s1189_s12  }
   0x8   : > { %p54_p0 = scmp.ne.s32.totalorder %s879_s13, %s875_s12  ;;  %p958_p1 = scmp.eq.s32.totalorder %s538_s18, 0 }
   0x9   : > { %p962_p2 = scmp.eq.s32.totalorder %s538_s18, 1  ;;  %p131_p3 = scmp.eq.s32.totalorder %s539_s19, 1 }
   0xa   : > { %s1174_s20 = scalar_select %p958_p1, 1, 0 }
   0xb   : > { %s1175_s21 = scalar_select %p962_p2, 1, 0 }
   0xc   : > { %p968_p4 = por %p958_p1, %p54_p0  ;;  %p540_p5 = scmp.ge.s32.totalorder %s895_s17, 1 }
   0xd   : > { %p973_p6 = por %p131_p3, %p54_p0  ;;  %p138_p7 = scmp.lt.s32.totalorder %s895_s17, 3 }
   0xe   : > { %s1176_s22 = scalar_select %p968_p4, 1, 0 }
   0xf   : > { %s1177_s23 = scalar_select %p973_p6, 1, 0 }
  0x10   : > { %p978_p8 = pnand %p540_p5, %p138_p7  ;;  %s897_s25 = smov [#allocation6]  }
  0x11   : > { %s153_s26 = sshll.u32 %s897_s25, 4  ;;  %s32_s28 = sadd.s32 1, %s891_s16  ;;  %s154_s26 = int_to_ptr.vmem [resolvable:$true] %s153_s26 }
  0x12   : > { %s1178_s24 = scalar_select %p978_p8, 1, 0 }
  0x13   : > { %p682_p9 = pneg %p978_p8  ;;  %s751_s4 = scalar_lea.hbm %s1167_s1, 2048 }
  0x14   : > { %p752_p12 = scmp.ne.s32.totalorder %s1167_s1, %s751_s4  ;;  %p758_p5 = scmp.lt.u32.totalorder %s751_s4, %s1167_s1 }
  0x15   : > { %p987_p11 = pnand %p682_p9, %p958_p1 }
  0x17   : > { %p753_p13 = pneg %p987_p11 }
  0x19   : > { %p754_p0 = pnand %p753_p13, %p752_p12 }
  0x1b   : > { %p755_p3 = pneg %p754_p0 }
  0x1d   : > { %p760_p7 = pnand %p758_p5, %p755_p3 }
  0x1f   : > { %763 = shalt.err (!%p760_p7)
}
  0x20   : > { %s764_s9 = scalar_lea.vmem %s154_s26, 2048  ;;  %p772_p1 = scmp.lt.s32.totalorder %s154_s26, %s154_s26 }
  0x21   : > { %p765_p9 = scmp.ne.s32.totalorder %s154_s26, %s764_s9  ;;  %p773_p4 = scmp.lt.s32.totalorder %s764_s9, %s764_s9 }
  0x23   : > { %p767_p10 = pnand %p765_p9, %p753_p13  ;;  %p774_p8 = por %p773_p4, %p772_p1 }
  0x25   : > { %p768_p6 = pneg %p767_p10 }
  0x27   : > { %p775_p2 = pnand %p774_p8, %p768_p6 }
  0x29   : > { %778 = shalt.err (!%p775_p2)
}
  0x2a   : > { %s898_s10 = smov 128   ;;  %s899_s11 = smov 8  }
  0x2b   : > { %685 = dma.hbm_to_vmem [thread:$0]  (!%p987_p11), %s1167_s1, 2048, %s154_s26, [#allocation7], %s898_s10, %s898_s10, %s899_s11  }
  0x2c   : > { %p34_p1 = scmp.ge.s32.totalorder %s32_s28, 2  ;;  %s41_s25 = sadd.s32 1, %s883_s14 }
  0x2d   : > { %p48_p2 = scmp.ne.s32.totalorder %s883_s14, %s879_s13  ;;  %p49_p4 = scmp.eq.s32.totalorder %s895_s17, 0 }
  0x2e   : > { %s1195_s28 = smov (%p34_p1, %s32_s28), 0  ;;  %p1181_p8 = scmp.ne.s32.totalorder %s1175_s21, 0 }
  0x2f   : > { %p1017_p6 = por %p49_p4, %p48_p2  ;;  %s36_s30 = ssub.s32 %s891_s16, %s1195_s28 }
  0x30   : > { %p1023_p10 = por %p1181_p8, %p48_p2  ;;  %p695_p12 = scmp.lt.s32.totalorder %s895_s17, 2 }
  0x31   : > { %p39_p11 = scmp.eq.s32.totalorder %s36_s30, 0  ;;  %s170_s26 = sand.u32 1, %s883_s14  }
  0x32   : > { %s543_s4 = sshll.u32 %s170_s26, 6  ;;  %s556_s6 = sshll.u32 %s891_s16, 10 }
  0x33   : > { %s1032_s5 = scalar_select %p39_p11, %s883_s14, %s41_s25  }
  0x34   : > { %s1038_s9 = scalar_lea.hbm %s1166_s0, %s556_s6  ;;  %s174_s21 = scalar_lea.vmem [#allocation3], %s543_s4 }
  0x35   : > { %s182_s18 = sshll.u32 %s174_s21, 4  ;;  %p1044_p13 = pnand %p695_p12, %p1017_p6  ;;  %s1040_s18 = int_to_ptr.vmem [resolvable:$true] %s182_s18 }
  0x36   : > { %s1048_s25 = scalar_lea.sflag [#allocation4], %s170_s26  ;;  %s779_s30 = scalar_lea.hbm %s1038_s9, 1024 }
  0x37   : > { %p780_p0 = scmp.ne.s32.totalorder %s1038_s9, %s779_s30  ;;  %p781_p3 = pneg %p1044_p13 }
  0x38   : > { %s784_s29 = scalar_lea.hbm %s1166_s0, 2048  ;;  %p785_p9 = scmp.lt.u32.totalorder %s1038_s9, %s1166_s0 }
  0x39   : > { %p782_p5 = pnand %p781_p3, %p780_p0  ;;  %p786_p1 = scmp.lt.u32.totalorder %s784_s29, %s779_s30 }
  0x3a   : > { %p788_p4 = scmp.lt.u32.totalorder %s779_s30, %s1038_s9 }
  0x3b   : > { %p783_p7 = pneg %p782_p5  ;;  %p787_p2 = por %p786_p1, %p785_p9 }
  0x3d   : > { %p789_p6 = por %p788_p4, %p787_p2 }
  0x3f   : > { %p790_p8 = pnand %p789_p6, %p783_p7 }
  0x41   : > { %793 = shalt.err (!%p790_p8)
}
  0x42   : > { %s794_s26 = scalar_lea.vmem %s1040_s18, 1024  ;;  %s900_s21 = smov [#allocation3]  }
  0x43   : > { %p795_p12 = scmp.ne.s32.totalorder %s1040_s18, %s794_s26  ;;  %s799_s4 = sshll.u32 %s900_s21, 4  ;;  %s800_s4 = int_to_ptr.vmem [resolvable:$false] %s799_s4 }
  0x44   : > { %s801_s6 = scalar_lea.vmem %s800_s4, 2048  ;;  %p802_p5 = scmp.lt.s32.totalorder %s1040_s18, %s800_s4 }
  0x45   : > { %p797_p11 = pnand %p795_p12, %p781_p3  ;;  %p803_p9 = scmp.lt.s32.totalorder %s801_s6, %s794_s26 }
  0x47   : > { %p798_p0 = pneg %p797_p11  ;;  %p804_p1 = por %p803_p9, %p802_p5 }
  0x49   : > { %p805_p2 = pnand %p804_p1, %p798_p0 }
  0x4b   : > { %808 = shalt.err (!%p805_p2)
}
  0x4c   : > { %689 = dma.hbm_to_vmem [thread:$0]  (!%p1044_p13), %s1038_s9, 1024, %s1040_s18, %s1048_s25, %s898_s10, %s898_s10, %s899_s11  }
  0x4d   : > { %p1184_p3 = scmp.ne.s32.totalorder %s1178_s24, 0 }
  0x4e   : > { %s1082_s30 = sand.u32 (!%p1184_p3), 1, %s879_s13   ;;  %p1185_p7 = scmp.ne.s32.totalorder (!%p1184_p3), %s1176_s22, 0 }
  0x4f   : > { %194 = sbr.rel (%p1184_p3) target bundleno = 359 (0x167), region = 32  ;;  %s547_s29 = sshll.u32 (!%p1184_p3), %s1082_s30, 6 }
  0x50   : > { %s197_s7 = scalar_lea.sflag (!%p1184_p3), [#allocation4], %s1082_s30  ;;  %s1088_s19 = scalar_lea.vmem (!%p1184_p3), [#allocation3], %s547_s29 }
  0x56   : > { %862 = dma.done.wait (%p1185_p7), %s197_s7, 1024  }
  0x57   : > { %864 = vsyncadd (%p1185_p7), %s197_s7, 4294966272  ;;  %p1186_p13 = scmp.ne.s32.totalorder %s1174_s20, 0 }
  0x59   : > { %866 = dma.done.wait (%p1186_p13), [#allocation7], 2048  }
  0x5a   : > { %868 = vsyncadd (%p1186_p13), [#allocation7], 4294965248  ;;  %v258_v0 = vld [vmem:[#allocation6] sm:$0xff]  ;;  %v259_v1 = vld [vmem:[#allocation6 + $0x8] sm:$0xff]  ;;  %s226_s24 = scalar_lea.vmem [#allocation8], %s547_s29  ;;  %s557_s11 = sshll.u32 %s887_s15, 10 }
  0x5b   : > { %v260_v2 = vld [vmem:[#allocation6 + $0x10] sm:$0xff]  ;;  %v626_v3 = vpack.c.bf16 %v259_v1, %v258_v0  ;;  %v261_v4 = vld [vmem:[#allocation6 + $0x18] sm:$0xff]  ;;  %v262_v6 = vld [vmem:[#allocation6 + $0x20] sm:$0xff]  ;;  %s443_s10 = sshll.u32 %s226_s24, 4  ;;  %s1117_s15 = scalar_lea.hbm %s1169_s3, %s557_s11  ;;  %s1112_s10 = int_to_ptr.vmem [resolvable:$true] %s443_s10 }
  0x5c   : > { %v630_v5 = vpack.c.bf16 %v261_v4, %v260_v2  ;;  %v263_v7 = vld [vmem:[#allocation6 + $0x28] sm:$0xff]  ;;  %v250_v9 = vld [vmem:[%s1088_s19] sm:$0xff]  ;;  %v264_v11 = vld [vmem:[#allocation6 + $0x30] sm:$0xff]  ;;  %s430_s25 = scalar_lea.sflag [#allocation5], %s1082_s30  ;;  %s809_s8 = scalar_lea.vmem %s1112_s10, 1024 }
  0x5d   : > { %627 = vmatprep.subr.bf16.mxu0 %v626_v3  ;;  %658 = vmatprep.subr.bf16.mxu1 %v626_v3  ;;  %v634_v8 = vpack.c.bf16 %v263_v7, %v262_v6  ;;  %v254_v10 = vld [vmem:[%s1088_s19 + $0x20] sm:$0xff]  ;;  %v265_v12 = vld [vmem:[#allocation6 + $0x38] sm:$0xff]  ;;  %v267_v15 = vld [vmem:[#allocation6 + $0x48] sm:$0xff]  ;;  %p810_p4 = scmp.ne.s32.totalorder %s1112_s10, %s809_s8  ;;  %s901_s26 = smov [#allocation8]  }
  0x5e   : > { %629 = vmatpush3.bf16.msra.mxu0 %v626_v3  ;;  %666 = vmatpush3.bf16.msra.mxu1 %v626_v3  ;;  %v638_v13 = vpack.c.bf16 %v265_v12, %v264_v11  ;;  %v266_v14 = vld [vmem:[#allocation6 + $0x40] sm:$0xff]  ;;  %v268_v17 = vld [vmem:[#allocation6 + $0x50] sm:$0xff]  ;;  %v269_v18 = vld [vmem:[#allocation6 + $0x58] sm:$0xff]  ;;  %s813_s21 = sshll.u32 %s901_s26, 4  ;;  %s814_s21 = int_to_ptr.vmem [resolvable:$false] %s813_s21 }
  0x5f   : > { %631 = vmatprep.subr.bf16.mxu0 %v630_v5  ;;  %659 = vmatprep.subr.bf16.mxu1 %v630_v5  ;;  %v642_v16 = vpack.c.bf16 %v267_v15, %v266_v14  ;;  %v646_v19 = vpack.c.bf16 %v269_v18, %v268_v17  ;;  %v270_v20 = vld [vmem:[#allocation6 + $0x60] sm:$0xff]  ;;  %v271_v21 = vld [vmem:[#allocation6 + $0x68] sm:$0xff]  ;;  %v272_v23 = vld [vmem:[#allocation6 + $0x70] sm:$0xff]  ;;  %p811_p6 = pnand %p810_p4, %p1023_p10  ;;  %s815_s4 = scalar_lea.vmem %s814_s21, 2048 }
  0x60   : > { %614 = vmatprep.mubr.f32.mxu0 %v250_v9  ;;  %620 = vmatprep.mubr.f32.mxu1 %v254_v10  ;;  %v650_v22 = vpack.c.bf16 %v271_v21, %v270_v20  ;;  %v273_v24 = vld [vmem:[#allocation6 + $0x78] sm:$0xff]  ;;  %v251_v26 = vld [vmem:[%s1088_s19 + $0x8] sm:$0xff]  ;;  %v252_v28 = vld [vmem:[%s1088_s19 + $0x10] sm:$0xff]  ;;  %p816_p12 = scmp.lt.s32.totalorder %s1112_s10, %s814_s21  ;;  %p817_p11 = scmp.lt.s32.totalorder %s815_s4, %s809_s8 }
  0x61   : > { %v654_v25 = vpack.c.bf16 %v273_v24, %v272_v23  ;;  %v255_v27 = vld [vmem:[%s1088_s19 + $0x28] sm:$0xff]  ;;  %v256_v29 = vld [vmem:[%s1088_s19 + $0x30] sm:$0xff]  ;;  %v253_v30 = vld [vmem:[%s1088_s19 + $0x18] sm:$0xff]  ;;  %p812_p8 = pneg %p811_p6 }
  0x62   : > { %633 = vmatpush3.bf16.msra.mxu0 %v630_v5  ;;  %667 = vmatpush3.bf16.msra.mxu1 %v630_v5  ;;  %v257_v31 = vld [vmem:[%s1088_s19 + $0x38] sm:$0xff]  ;;  %v550_v32 = vld [vmem:[%s1168_s2] ss:$0 sm:$0xff]  ;;  %p818_p0 = por %p817_p11, %p816_p12 }
  0x63   : > { %635 = vmatprep.subr.bf16.mxu0 %v634_v8  ;;  %660 = vmatprep.subr.bf16.mxu1 %v634_v8 }
  0x64   : > { %p819_p5 = pnand %p818_p0, %p812_p8 }
  0x66   : > { %637 = vmatpush3.bf16.msra.mxu0 %v634_v8  ;;  %668 = vmatpush3.bf16.msra.mxu1 %v634_v8 }
  0x67   : > { %639 = vmatprep.subr.bf16.mxu0 %v638_v13  ;;  %661 = vmatprep.subr.bf16.mxu1 %v638_v13 }
  0x6a   : > { %641 = vmatpush3.bf16.msra.mxu0 %v638_v13  ;;  %669 = vmatpush3.bf16.msra.mxu1 %v638_v13 }
  0x6b   : > { %643 = vmatprep.subr.bf16.mxu0 %v642_v16  ;;  %662 = vmatprep.subr.bf16.mxu1 %v642_v16 }
  0x6e   : > { %645 = vmatpush3.bf16.msra.mxu0 %v642_v16  ;;  %670 = vmatpush3.bf16.msra.mxu1 %v642_v16 }
  0x6f   : > { %647 = vmatprep.subr.bf16.mxu0 %v646_v19  ;;  %663 = vmatprep.subr.bf16.mxu1 %v646_v19 }
  0x72   : > { %649 = vmatpush3.bf16.msra.mxu0 %v646_v19  ;;  %671 = vmatpush3.bf16.msra.mxu1 %v646_v19 }
  0x73   : > { %651 = vmatprep.subr.bf16.mxu0 %v650_v22  ;;  %664 = vmatprep.subr.bf16.mxu1 %v650_v22 }
  0x76   : > { %653 = vmatpush3.bf16.msra.mxu0 %v650_v22  ;;  %672 = vmatpush3.bf16.msra.mxu1 %v650_v22 }
  0x77   : > { %655 = vmatprep.subr.bf16.mxu0 %v654_v25  ;;  %665 = vmatprep.subr.bf16.mxu1 %v654_v25 }
  0x7a   : > { %657 = vmatpush3.bf16.msra.mxu0 %v654_v25  ;;  %673 = vmatpush3.bf16.msra.mxu1 %v654_v25 }
  0x7d   : > { %615 = vmatmul.mubr.f32.vlgmr.msra.gmra.mrb[0].mxu0 %v251_v26  ;;  %621 = vmatmul.mubr.f32.vlgmr.msra.gmra.mrb[0].mxu1 %v255_v27 }
  0x7e   : > { %617 = vmatprep.mubr.f32.mxu0 %v252_v28  ;;  %623 = vmatprep.mubr.f32.mxu1 %v256_v29 }
  0x81   : > { %618 = vmatmul.mubr.f32.gmra.mrb[2].mxu0 %v253_v30  ;;  %624 = vmatmul.mubr.f32.gmra.mrb[2].mxu1 %v257_v31 }
 0x150   : > { %v616_v33 = vpop.f32.mrb[0].mxu0  ;;  %v622_v34 = vpop.f32.mrb[0].mxu1 }
 0x151   : > { %v414_v35 = vadd.f32 %v616_v33, %v550_v32  ;;  %v418_v36 = vadd.f32 %v622_v34, %v550_v32  ;;  %v340_v37 = vpop.f32.mrb[1].mxu0  ;;  %v360_v38 = vpop.f32.mrb[1].mxu1 }
 0x152   : > { %v413_v39 = vadd.f32 %v550_v32, %v340_v37  ;;  %v417_v40 = vadd.f32 %v550_v32, %v360_v38 }
 0x153   : > { %422 = vst [vmem:[%s226_s24 + $0x8] sm:$0xff] %v414_v35  ;;  %426 = vst [vmem:[%s226_s24 + $0x28] sm:$0xff] %v418_v36 }
 0x154   : > { %421 = vst [vmem:[%s226_s24] sm:$0xff] %v413_v39  ;;  %425 = vst [vmem:[%s226_s24 + $0x20] sm:$0xff] %v417_v40  ;;  %v619_v41 = vpop.f32.mrb[2].mxu0  ;;  %v625_v42 = vpop.f32.mrb[2].mxu1 }
 0x155   : > { %v416_v43 = vadd.f32 %v619_v41, %v550_v32  ;;  %v420_v44 = vadd.f32 %v625_v42, %v550_v32  ;;  %v350_v45 = vpop.f32.mrb[3].mxu0  ;;  %v370_v46 = vpop.f32.mrb[3].mxu1 }
 0x156   : > { %v415_v47 = vadd.f32 %v550_v32, %v350_v45  ;;  %v419_v48 = vadd.f32 %v550_v32, %v370_v46 }
 0x157   : > { %424 = vst [vmem:[%s226_s24 + $0x18] sm:$0xff] %v416_v43  ;;  %428 = vst [vmem:[%s226_s24 + $0x38] sm:$0xff] %v420_v44 }
 0x158   : > { %423 = vst [vmem:[%s226_s24 + $0x10] sm:$0xff] %v415_v47  ;;  %427 = vst [vmem:[%s226_s24 + $0x30] sm:$0xff] %v419_v48 }
 0x159   : > { %822 = shalt.err (!%p819_p5)
}
 0x15a   : > { %s823_s6 = scalar_lea.hbm %s1117_s15, 1024  ;;  %s827_s19 = scalar_lea.hbm %s1169_s3, 2048 }
 0x15b   : > { %p824_p9 = scmp.ne.s32.totalorder %s1117_s15, %s823_s6  ;;  %p828_p3 = scmp.lt.u32.totalorder %s1117_s15, %s1169_s3 }
 0x15c   : > { %p829_p7 = scmp.lt.u32.totalorder %s827_s19, %s823_s6  ;;  %p831_p4 = scmp.lt.u32.totalorder %s823_s6, %s1117_s15 }
 0x15d   : > { %p825_p1 = pnand %p824_p9, %p1023_p10 }
 0x15e   : > { %p830_p13 = por %p829_p7, %p828_p3 }
 0x15f   : > { %p826_p2 = pneg %p825_p1 }
 0x160   : > { %p832_p6 = por %p831_p4, %p830_p13 }
 0x162   : > { %p833_p8 = pnand %p832_p6, %p826_p2 }
 0x164   : > { %836 = shalt.err (!%p833_p8)
}
 0x165   : > { %s902_s24 = smov 128   ;;  %s903_s11 = smov 8  }
 0x166   : > { %680 = dma.vmem_to_hbm [thread:$0]  (%p1023_p10), %s1112_s10, 1024, %s1117_s15, %s430_s25, %s902_s24, %s902_s24, %s903_s11  }
 0x167 PF: > { %s458_s9 = sand.u32 1, %s875_s12   ;;  %p1187_p12 = scmp.ne.s32.totalorder %s1177_s23, 0 }
 0x168   : > { %p1188_p11 = scmp.ge.s32.totalorder %s895_s17, 2  ;;  %s459_s18 = scalar_lea.sflag [#allocation5], %s458_s9 }
 0x16a   : > { %p691_p0 = pnand %p1188_p11, %p1187_p12 }
 0x16c   : > { %870 = dma.done.wait (!%p691_p0), %s459_s18, 1024  }
 0x16d   : > { %872 = vsyncadd (!%p691_p0), %s459_s18, 4294966272  ;;  %s20_s17 = sadd.s32 1, %s895_s17   ;;  %s1189_s12 = smov %s879_s13 }
 0x16e   : > { %p17_p5 = scmp.ge.s32.totalorder %s20_s17, 4   ;;  %s1190_s13 = smov %s883_s14 }
 0x16f   : > { %s1191_s14 = smov %s1032_s5  ;;  %s1192_s15 = smov %s891_s16 }
 0x170   : > { %s1193_s16 = smov %s1195_s28  ;;  %19 = sbr.rel (!%p17_p5) target bundleno = 7 (0x7), region = 90 }
 0x177   :  { %464 = vsyncpa [#allocation4], 1 }
 0x178   :  { %466 = vsyncpa [#allocation4 + $0x1], 1 }
 0x179   :  { %467 = vsyncpa [#allocation7], 1 }
 0x17a   :  { %468 = vsyncpa [#allocation5], 1 }
 0x17b   :  { %470 = vsyncpa [#allocation5 + $0x1], 1 }

</bundles_post_ra>
